<compile_context>
chip_gen: v7x
topology: tpu7x:2x2x1
jax: 0.10.0
libtpu: 0.0.40
codegen_flags: <defaults>
</compile_context>

<pallas_src>
import functools

import jax
import jax.numpy as jnp
from jax.experimental import pallas as pl
from jax.experimental.pallas import tpu as pltpu


def _round_up(x, m):
    return ((x + m - 1) // m) * m


def linear_kernel(x_ref, w_ref, b_ref, o_ref):
    """One (tm, tn) output tile. Grid = (M/tm, N/tn, K/tk), K innermost.

    x_ref: (tm, tk) bf16  activations
    w_ref: (tk, tn) bf16  weight, pre-transposed to canonical (K, N)
    b_ref: (1,  tn) f32   bias
    o_ref: (tm, tn) f32   output tile; doubles as the f32 accumulator
                          (block index (i, j) is constant across k -> resident)
    """
    k = pl.program_id(2)

    # Fold the bias into the accumulator init: no separate finalize add.
    @pl.when(k == 0)
    def _():
        o_ref[...] = jnp.broadcast_to(b_ref[...], o_ref.shape)

    # Canonical (tm, tk) @ (tk, tn): streams straight into the MXU, f32 acc.
    o_ref[...] += jnp.dot(x_ref[...], w_ref[...],
                          preferred_element_type=jnp.float32)


def prepare_linear_params(weight, bias, *, tn=512, tk=2048):
    """One-time parameter prep (hoisted out of the per-call path).

    weight: (Out, In) f32 (PyTorch layout) -> (K, N) = (In, Out) bf16, padded
    to tile multiples. bias: (Out,) f32 -> (1, N) f32, padded.
    """
    Out, In = weight.shape
    tn = min(tn, _round_up(Out, 128))
    tk = min(tk, _round_up(In, 128))
    N = _round_up(Out, tn)
    K = _round_up(In, tk)

    wp = jnp.pad(weight.T.astype(jnp.bfloat16), ((0, K - In), (0, N - Out)))
    bp = jnp.pad(bias.astype(jnp.float32), (0, N - Out)).reshape(1, N)
    meta = (Out, In, tn, tk)
    return wp, bp, meta


@functools.partial(
    jax.jit, static_argnames=("out_features", "in_features", "tm", "tn", "tk"))
def _linear_pallas(x, wp, bp, *, out_features, in_features, tm, tn, tk):
    B, In = x.shape
    assert In == in_features, "x feature dim must match weight In"
    K, N = wp.shape

    M = _round_up(B, tm)
    xp = x.astype(jnp.bfloat16)
    if (M, K) != (B, In):
        xp = jnp.pad(xp, ((0, M - B), (0, K - In)))

    grid = (M // tm, N // tn, K // tk)

    # VMEM budget: double-buffered bf16 x/W tiles + resident f32 out + bias.
    vmem_bytes = 2 * (tm * tk * 2 + tk * tn * 2 + tn * 4) + 2 * tm * tn * 4
    vmem_limit = int(min(max(2 * vmem_bytes, 32 << 20), 48 << 20))  # v7x-safe

    out = pl.pallas_call(
        linear_kernel,
        out_shape=jax.ShapeDtypeStruct((M, N), jnp.float32),
        grid_spec=pltpu.PrefetchScalarGridSpec(
            num_scalar_prefetch=0,
            grid=grid,
            in_specs=[
                pl.BlockSpec((tm, tk), lambda i, j, k: (i, k)),  # x tile
                pl.BlockSpec((tk, tn), lambda i, j, k: (k, j)),  # W tile (K,N)
                pl.BlockSpec((1, tn), lambda i, j, k: (0, j)),   # bias tile
            ],
            out_specs=pl.BlockSpec((tm, tn), lambda i, j, k: (i, j)),
        ),
        compiler_params=pltpu.CompilerParams(
            dimension_semantics=("parallel", "parallel", "arbitrary"),
            vmem_limit_bytes=vmem_limit,
        ),
    )(xp, wp, bp)

    return out[:B, :out_features].astype(x.dtype)


def simple_nn_forward(x, wp, bp, meta, *, tm=512):
    """SimpleNN forward: y = x @ weight.T + bias, with prepared params."""
    Out, In, tn, tk = meta
    B = x.shape[0]
    tm = min(tm, _round_up(B, 8))

    # v7x megacore: try to expose >= 2 "parallel" grid points so both TCs
    # get work (no effect on single-TC v5e/v6e).
    M = _round_up(B, tm)
    N = _round_up(Out, tn)
    if (M // tm) * (N // tn) == 1:
        if tn > 128 and (tn // 2) % 128 == 0:
            tn //= 2
        elif tm > 8 and (tm // 2) % 8 == 0:
            tm //= 2

    return _linear_pallas(x, wp, bp, out_features=Out, in_features=In,
                          tm=tm, tn=tn, tk=tk)


if __name__ == "__main__":
    # SimpleNN(input_size=32, output_size=16), batch of 8
    input_size, output_size, batch = 32, 16, 8

    key = jax.random.PRNGKey(0)
    kx, kw, kb = jax.random.split(key, 3)

    x = jax.random.normal(kx, (batch, input_size), dtype=jnp.float32)
    # Deterministic init mimicking nn.Linear's uniform(-1/sqrt(In), 1/sqrt(In))
    bound = 1.0 / (input_size ** 0.5)
    weight = jax.random.uniform(
        kw, (output_size, input_size), minval=-bound, maxval=bound,
        dtype=jnp.float32)
    bias = jax.random.uniform(
        kb, (output_size,), minval=-bound, maxval=bound, dtype=jnp.float32)

    # One-time param prep (transpose/pad/cast hoisted out of the forward).
    wp, bp, meta = prepare_linear_params(weight, bias)

    y = simple_nn_forward(x, wp, bp, meta)
    jax.block_until_ready(y)

    # Reference check (loose tolerance: operands are cast to bf16 for the MXU,
    # accumulation and bias add stay f32).
    y_ref = x @ weight.T + bias
    assert y.shape == y_ref.shape, "shape mismatch vs reference"
    assert jnp.allclose(y, y_ref, atol=5e-2, rtol=5e-2), "mismatch vs reference"

    print("KERNEL_OK")
</pallas_src>

<mosaic_0001>
module attributes {stable_mosaic.version = 11 : i64} {
  func.func @linear_kernel(%arg0: i32, %arg1: i32, %arg2: i32, %arg3: memref<8x128xbf16, #tpu.memory_space<vmem>>, %arg4: memref<128x128xbf16, #tpu.memory_space<vmem>>, %arg5: memref<1x128xf32, #tpu.memory_space<vmem>>, %arg6: memref<8x128xf32, #tpu.memory_space<vmem>>) attributes {dimension_semantics = [#tpu.dimension_semantics<parallel>, #tpu.dimension_semantics<parallel>, #tpu.dimension_semantics<arbitrary>], iteration_bounds = array<i64: 1, 1, 1>, scalar_prefetch = 0 : i64, scratch_operands = 0 : i64, tpu.core_type = #tpu.core_type<tc>, window_params = [{transform_indices = @transform_0, window_bounds = array<i64: 8, 128>}, {transform_indices = @transform_1, window_bounds = array<i64: 128, 128>}, {transform_indices = @transform_2, window_bounds = array<i64: 1, 128>}, {transform_indices = @transform_3, window_bounds = array<i64: 8, 128>}]} {
    %c0_i32 = arith.constant 0 : i32
    %0 = arith.cmpi eq, %arg2, %c0_i32 : i32
    %1 = arith.extui %0 : i1 to i32
    %c0_i32_0 = arith.constant 0 : i32
    %2 = arith.cmpi ne, %1, %c0_i32_0 : i32
    scf.if %2 {
      %c0_8 = arith.constant 0 : index
      %c0_9 = arith.constant 0 : index
      %9 = vector.load %arg5[%c0_8, %c0_9] : memref<1x128xf32, #tpu.memory_space<vmem>>, vector<1x128xf32>
      %10 = vector.shape_cast %9 : vector<1x128xf32> to vector<1x128xf32>
      %11 = vector.broadcast %10 : vector<1x128xf32> to vector<8x128xf32>
      %c0_10 = arith.constant 0 : index
      %c0_11 = arith.constant 0 : index
      %12 = vector.load %arg6[%c0_10, %c0_11] : memref<8x128xf32, #tpu.memory_space<vmem>>, vector<8x128xf32>
      tpu.vector_store %arg6[%c0_10, %c0_11], %11 {strides = array<i32>} : memref<8x128xf32, #tpu.memory_space<vmem>>, vector<8x128xf32>,
    } else {
    }
    %c0 = arith.constant 0 : index
    %c0_1 = arith.constant 0 : index
    %3 = vector.load %arg6[%c0, %c0_1] : memref<8x128xf32, #tpu.memory_space<vmem>>, vector<8x128xf32>
    %c0_2 = arith.constant 0 : index
    %c0_3 = arith.constant 0 : index
    %4 = vector.load %arg3[%c0_2, %c0_3] : memref<8x128xbf16, #tpu.memory_space<vmem>>, vector<8x128xbf16>
    %c0_4 = arith.constant 0 : index
    %c0_5 = arith.constant 0 : index
    %5 = vector.load %arg4[%c0_4, %c0_5] : memref<128x128xbf16, #tpu.memory_space<vmem>>, vector<128x128xbf16>
    %cst = arith.constant dense<0.000000e+00> : vector<8x128xf32>
    %6 = tpu.matmul %4, %5, %cst {dimension_numbers = #tpu.dot_dimension_numbers<[1], [0], [0], [1], [0, 0, 1, 1], [], []>} : vector<8x128xbf16>, vector<128x128xbf16>, vector<8x128xf32> -> vector<8x128xf32>
    %7 = arith.addf %3, %6 : vector<8x128xf32>
    %c0_6 = arith.constant 0 : index
    %c0_7 = arith.constant 0 : index
    %8 = vector.load %arg6[%c0_6, %c0_7] : memref<8x128xf32, #tpu.memory_space<vmem>>, vector<8x128xf32>
    tpu.vector_store %arg6[%c0_6, %c0_7], %7 {strides = array<i32>} : memref<8x128xf32, #tpu.memory_space<vmem>>, vector<8x128xf32>,
    return
  }
  func.func @transform_0(%arg0: i32, %arg1: i32, %arg2: i32) -> (i32, i32) {
    %c0_i32 = arith.constant 0 : i32
    return %arg0, %arg2 : i32, i32
  }
  func.func @transform_1(%arg0: i32, %arg1: i32, %arg2: i32) -> (i32, i32) {
    %c0_i32 = arith.constant 0 : i32
    return %arg2, %arg1 : i32, i32
  }
  func.func @transform_2(%arg0: i32, %arg1: i32, %arg2: i32) -> (i32, i32) {
    %c0_i32 = arith.constant 0 : i32
    %c0_i32_0 = arith.constant 0 : i32
    return %c0_i32, %arg1 : i32, i32
  }
  func.func @transform_3(%arg0: i32, %arg1: i32, %arg2: i32) -> (i32, i32) {
    %c0_i32 = arith.constant 0 : i32
    return %arg0, %arg1 : i32, i32
  }
}

</mosaic_0001>

<bundles_post_ra>
// kernel: _linear_pallas.1
= control target key start
LH: loop header
LB: loop body
LE: loop exit
PB: predicated region body
PF: predicated region fallthrough
CT: control target
= control target key end

     0   :  { %8 = vsyncpa [#allocation3], 0  ;;  %s321_s0 = inlined_call_operand.vmem [shape: bf16[8,128], index: 0, kind: input, shape index: {}]   ;;  %s322_s1 = inlined_call_operand.hbm [shape: bf16[128,128], index: 1, kind: input, shape index: {}]   ;;  %s323_s2 = inlined_call_operand.vmem [shape: f32[1,128], index: 2, kind: input, shape index: {}]   ;;  %s324_s3 = inlined_call_operand.hbm [shape: f32[8,128], index: 3, kind: output, shape index: {}]  }
   0x1   :  { %9 = vsyncpa [#allocation4], 0  ;;  %s265_s12 = smov [#allocation2]   ;;  %s217_s16 = scalar_lea.hbm %s322_s1, 1024 }
   0x2   :  { %s17_s13 = sshll.u32 %s265_s12, 4  ;;  %p218_p0 = scmp.ne.s32.totalorder %s322_s1, %s217_s16  ;;  %s18_s13 = int_to_ptr.vmem [resolvable:$true] %s17_s13 }
   0x3   :  { %p221_p1 = scmp.lt.u32.totalorder %s217_s16, %s322_s1 }
   0x5   :  { %p223_p2 = pnand %p221_p1, %p218_p0 }
   0x7   :  { %226 = shalt.err (!%p223_p2)
}
   0x8   :  { %s227_s21 = scalar_lea.vmem %s18_s13, 1024  ;;  %p232_p4 = scmp.lt.s32.totalorder %s18_s13, %s18_s13 }
   0x9   :  { %p228_p3 = scmp.ne.s32.totalorder %s18_s13, %s227_s21  ;;  %p233_p5 = scmp.lt.s32.totalorder %s227_s21, %s227_s21 }
   0xb   :  { %p234_p6 = por %p233_p5, %p232_p4 }
   0xd   :  { %p235_p7 = pnand %p234_p6, %p228_p3 }
   0xf   :  { %238 = shalt.err (!%p235_p7)
}
  0x10   :  { %s266_s22 = smov 64   ;;  %s267_s23 = smov 4  }
  0x11   :  { %23 = dma.hbm_to_vmem [thread:$0]  %s322_s1, 1024, %s18_s13, [#allocation3], %s266_s22, %s266_s22, %s267_s23  }
  0x12   :  { %261 = dma.done.wait [#allocation3], 1024  }
  0x13   :  { %262 = vsyncadd [#allocation3], 4294966272  ;;  %v268_v0 = vmov 0.0   ;;  %vm269_vm0 = vmmov 0   ;;  %v209_v1 = vld [vmem:[#allocation2] sm:$0xff]   ;;  %v210_v2 = vld [vmem:[#allocation2 + $0x8] sm:$0xff]  }
  0x14   :  { %183 = vmatprep.subr.bf16.mxu0 %v268_v0  ;;  %199 = vmatprep.mubr.msk.bf16.mxu0 %vm269_vm0, %v268_v0  ;;  %v211_v3 = vld [vmem:[#allocation2 + $0x10] sm:$0xff]   ;;  %v212_v4 = vld [vmem:[#allocation2 + $0x18] sm:$0xff]   ;;  %v213_v5 = vld [vmem:[#allocation2 + $0x20] sm:$0xff]   ;;  %s270_s29 = smov [#allocation5]  }
  0x15   :  { %184 = vmatpush3.bf16.msra.mxu0 %v209_v1  ;;  %v214_v6 = vld [vmem:[#allocation2 + $0x28] sm:$0xff]   ;;  %v215_v7 = vld [vmem:[#allocation2 + $0x30] sm:$0xff]   ;;  %v216_v8 = vld [vmem:[#allocation2 + $0x38] sm:$0xff]   ;;  %s156_s30 = sshll.u32 %s270_s29, 4  ;;  %s157_s30 = int_to_ptr.vmem [resolvable:$true] %s156_s30 }
  0x16   :  { %185 = vmatprep.subr.bf16.mxu0 %v268_v0  ;;  %v43_v9 = vld [vmem:[%s321_s0] sm:$0xf]  ;;  %s239_s4 = scalar_lea.vmem %s157_s30, 128  ;;  %p244_p9 = scmp.lt.s32.totalorder %s157_s30, %s157_s30 }
  0x17   :  { %v165_v10 = vld [vmem:[%s323_s2] ss:$0 sm:$0xff]  ;;  %p240_p8 = scmp.ne.s32.totalorder %s157_s30, %s239_s4  ;;  %p245_p10 = scmp.lt.s32.totalorder %s239_s4, %s239_s4 }
  0x19   :  { %186 = vmatpush3.bf16.msra.mxu0 %v210_v2  ;;  %p246_p11 = por %p245_p10, %p244_p9 }
  0x1a   :  { %187 = vmatprep.subr.bf16.mxu0 %v268_v0 }
  0x1b   :  { %p247_p12 = pnand %p246_p11, %p240_p8 }
  0x1d   :  { %188 = vmatpush3.bf16.msra.mxu0 %v211_v3 }
  0x1e   :  { %189 = vmatprep.subr.bf16.mxu0 %v268_v0 }
  0x21   :  { %190 = vmatpush3.bf16.msra.mxu0 %v212_v4 }
  0x22   :  { %191 = vmatprep.subr.bf16.mxu0 %v268_v0 }
  0x25   :  { %192 = vmatpush3.bf16.msra.mxu0 %v213_v5 }
  0x26   :  { %193 = vmatprep.subr.bf16.mxu0 %v268_v0 }
  0x29   :  { %194 = vmatpush3.bf16.msra.mxu0 %v214_v6 }
  0x2a   :  { %195 = vmatprep.subr.bf16.mxu0 %v268_v0 }
  0x2d   :  { %196 = vmatpush3.bf16.msra.mxu0 %v215_v7 }
  0x2e   :  { %197 = vmatprep.subr.bf16.mxu0 %v268_v0 }
  0x31   :  { %198 = vmatpush3.bf16.msra.mxu0 %v216_v8 }
  0x34   :  { %200 = vmatmul.mubr.bf16.vlgmr.msra.gmra.mrb[0].mxu0 %v43_v9 }
 0x107   :  { %v142_v11 = vpop.f32.mrb[0].mxu0 }
 0x108   :  { %v148_v12 = vadd.f32 %v165_v10, %v142_v11  ;;  %v201_v13 = vpop.f32.mrb[1].mxu0 }
 0x109   :  { %v145_v14 = vpop.f32.mrb[2].mxu0 }
 0x10a   :  { %149 = vst [vmem:[#allocation5] sm:$0xff] %v148_v12  ;;  %v202_v15 = vpop.f32.mrb[3].mxu0 }
 0x10b   :  { %250 = shalt.err (!%p247_p12)
}
 0x10c   :  { %s251_s2 = scalar_lea.hbm %s324_s3, 128 }
 0x10d   :  { %p252_p13 = scmp.ne.s32.totalorder %s324_s3, %s251_s2  ;;  %p255_p0 = scmp.lt.u32.totalorder %s251_s2, %s324_s3 }
 0x10f   :  { %p257_p1 = pnand %p255_p0, %p252_p13 }
 0x111   :  { %260 = shalt.err (!%p257_p1)
}
 0x112   :  { %159 = dma.vmem_to_hbm [thread:$0]  %s157_s30, 128, %s324_s3, [#allocation4]  }
 0x113   :  { %263 = dma.done.wait [#allocation4], 128  }
 0x114   :  { %264 = vsyncadd [#allocation4], 4294967168 }
 0x115   :  { %163 = vsyncpa [#allocation3], 1 }
 0x116   :  { %164 = vsyncpa [#allocation4], 1 }

</bundles_post_ra>
